<compile_context>
chip_gen: v6e
topology: v6e:2x2x1
jax: 0.10.0
libtpu: 0.0.40
codegen_flags: <defaults>
</compile_context>

<pallas_src>
import functools

import jax
import jax.numpy as jnp
from jax.experimental import pallas as pl
from jax.experimental.pallas import tpu as pltpu


def _gelu_tanh(x):
    # TODO(synk): config.activation is unspecified in the spec; tanh-approx
    # GELU (torch.nn.GELU(approximate='tanh')) is implemented here.
    c = jnp.sqrt(2.0 / jnp.pi).astype(x.dtype)
    return 0.5 * x * (1.0 + jnp.tanh(c * (x + 0.044715 * x * x * x)))


def _round_up(a, b):
    return (a + b - 1) // b * b


def _cdiv(a, b):
    return -(-a // b)


# ---------------------------------------------------------------------------
# Kernel: one (tm, C) row tile x one tn-wide hidden tile of fc1 -> GELU -> fc2.
# The f32 output block is the accumulator across the hidden ("arbitrary") axis.
# ---------------------------------------------------------------------------
def ffn_kernel(x_ref, w1_ref, b1_ref, w2_ref, b2_ref, o_ref):
    j = pl.program_id(1)

    @pl.when(j == 0)
    def _():
        # Seed the resident f32 output block with the fc2 bias: removes both
        # the zeros init and the epilogue (tm, C) bias add.
        o_ref[...] = jnp.broadcast_to(b2_ref[...], o_ref.shape)

    # fc1 slice: cast the f32 activation tile to bf16 in VMEM (weights arrive
    # from HBM already bf16, so no wrapper-side cast pass is needed).
    x_bf = x_ref[...].astype(jnp.bfloat16)
    h = jnp.dot(x_bf, w1_ref[...], preferred_element_type=jnp.float32)
    h = _gelu_tanh(h + b1_ref[...])  # f32 bias + GELU (VPU/EUP)

    # fc2 slice, accumulated straight into the VMEM-resident output block.
    o_ref[...] += jnp.dot(h.astype(w2_ref.dtype), w2_ref[...],
                          preferred_element_type=jnp.float32)


# ---------------------------------------------------------------------------
# Per-generation tile / VMEM sizing.
# ---------------------------------------------------------------------------
_TM_CANDIDATES = (1024, 768, 512, 384, 256, 128, 64, 32, 16, 8)
_TN_CANDIDATES = (1024, 512, 256, 128)


def _vmem_footprint(tm, tn, C):
    """Approximate VMEM bytes for one grid step (double-buffered pipeline)."""
    x_buf = 2 * tm * C * 4          # f32 input tile
    w1_buf = 2 * C * tn * 2         # bf16 fc1 weight tile
    w2_buf = 2 * tn * C * 2         # bf16 fc2 weight tile
    b_buf = 2 * (_round_up(tn, 128) + _round_up(C, 128)) * 4
    o_buf = 2 * tm * C * 4          # f32 resident output/accumulator tile
    tmp = 3 * tm * tn * 4           # in-kernel h (f32) + bf16 copy + slack
    return x_buf + w1_buf + w2_buf + b_buf + o_buf + tmp


def _auto_tiles(M, C, H):
    """Pick (tm, tn, vmem_limit_bytes) for the current TPU generation."""
    try:
        vmem_cap = int(pltpu.get_tpu_info().vmem_capacity_bytes)
    except Exception:
        vmem_cap = 64 * 1024 * 1024   # conservative fallback = v7x per-TC VMEM
    budget = int(vmem_cap * 0.75)

    tn_options = [t for t in _TN_CANDIDATES if H % t == 0] or [H]

    # Keep >= 2 row tiles when possible so v7x's two TensorCores both get work.
    tm_cap = _round_up(_cdiv(M, 2), 8) if M > 8 else _round_up(max(M, 1), 8)

    # tm has priority (arithmetic intensity over the re-streamed weights ~ tm);
    # for a given tm pick the largest hidden tile that still fits the budget.
    for tm_c in _TM_CANDIDATES:
        tm = min(tm_c, tm_cap)
        for tn in tn_options:
            if _vmem_footprint(tm, tn, C) <= budget:
                limit = min(int(vmem_cap * 0.85),
                            max(32 << 20, _vmem_footprint(tm, tn, C) + (8 << 20)))
                return tm, tn, limit
    tm, tn = 8, tn_options[-1]
    limit = min(int(vmem_cap * 0.85),
                max(32 << 20, _vmem_footprint(tm, tn, C) + (8 << 20)))
    return tm, tn, limit


# ---------------------------------------------------------------------------
# pallas_call wrapper.
# ---------------------------------------------------------------------------
@functools.partial(jax.jit, static_argnames=("tm", "tn", "vmem_limit"))
def _ffn_impl(x2d, w1, b1, w2, b2, *, tm, tn, vmem_limit):
    M, C = x2d.shape
    H = w1.shape[1]
    grid = (_cdiv(M, tm), H // tn)
    n_row_tiles = grid[0]

    cost = pl.CostEstimate(
        flops=4 * M * H * C,                         # two matmuls, 2*M*H*C each
        transcendentals=M * H,                       # tanh in GELU
        bytes_accessed=(M * C * 4                    # x read (f32)
                        + n_row_tiles * 2 * H * C * 2   # w1+w2 re-streamed/tile
                        + n_row_tiles * (H + C) * 4     # biases re-streamed
                        + M * C * 4),                # output write (f32)
    )

    return pl.pallas_call(
        ffn_kernel,
        out_shape=jax.ShapeDtypeStruct((M, C), jnp.float32),
        grid_spec=pltpu.PrefetchScalarGridSpec(
            num_scalar_prefetch=0,
            grid=grid,
            in_specs=[
                pl.BlockSpec((tm, C), lambda i, j: (i, 0)),   # x row tile (f32)
                pl.BlockSpec((C, tn), lambda i, j: (0, j)),   # w1 col tile (bf16)
                pl.BlockSpec((1, tn), lambda i, j: (0, j)),   # b1 tile (f32)
                pl.BlockSpec((tn, C), lambda i, j: (j, 0)),   # w2 row tile (bf16)
                pl.BlockSpec((1, C), lambda i, j: (0, 0)),    # b2 (f32)
            ],
            out_specs=pl.BlockSpec((tm, C), lambda i, j: (i, 0)),
        ),
        compiler_params=pltpu.CompilerParams(
            dimension_semantics=("parallel", "arbitrary"),
            vmem_limit_bytes=vmem_limit,
        ),
        cost_estimate=cost,
    )(x2d, w1, b1, w2, b2)


def feed_forward(x, w1, b1, w2, b2, *, tm=None, tn=None):
    """x: (B, T, C) f32; w1/w2: (in, out) bf16 matrices; b1/b2: f32 row vectors."""
    B, T, C = x.shape
    H = w1.shape[1]
    M = B * T

    # Weights should be stored persistently in bf16 by the caller; only cast
    # here as a fallback so the kernel path never sees f32 weight streams.
    if w1.dtype != jnp.bfloat16:
        w1 = w1.astype(jnp.bfloat16)
    if w2.dtype != jnp.bfloat16:
        w2 = w2.astype(jnp.bfloat16)
    b1 = b1.reshape(1, H).astype(jnp.float32)
    b2 = b2.reshape(1, C).astype(jnp.float32)

    a_tm, a_tn, vmem_limit = _auto_tiles(M, C, H)
    tm = tm or a_tm
    tn = tn or a_tn
    assert H % tn == 0, "hidden dim must be divisible by the hidden tile"
    vmem_limit = max(vmem_limit, _vmem_footprint(tm, tn, C) + (8 << 20))

    out2d = _ffn_impl(x.reshape(M, C).astype(jnp.float32), w1, b1, w2, b2,
                      tm=tm, tn=tn, vmem_limit=int(vmem_limit))
    return out2d.reshape(B, T, C)


def init_params(key, n_embd):
    """nn.Linear-style init (uniform +/- 1/sqrt(fan_in)); weights as (in, out)."""
    hidden = 4 * n_embd
    k1, k2, k3, k4 = jax.random.split(key, 4)
    lim1 = 1.0 / jnp.sqrt(n_embd)
    lim2 = 1.0 / jnp.sqrt(hidden)
    w1 = jax.random.uniform(k1, (n_embd, hidden), jnp.float32, -lim1, lim1)
    b1 = jax.random.uniform(k2, (1, hidden), jnp.float32, -lim1, lim1)
    w2 = jax.random.uniform(k3, (hidden, n_embd), jnp.float32, -lim2, lim2)
    b2 = jax.random.uniform(k4, (1, n_embd), jnp.float32, -lim2, lim2)
    return w1, b1, w2, b2


if __name__ == "__main__":
    key = jax.random.PRNGKey(0)
    k_x, k_p = jax.random.split(key)

    # Small but lane-dense demo: C=128 -> hidden=512 (both multiples of 128).
    batch, seq, n_embd = 2, 8, 128
    x = jax.random.normal(k_x, (batch, seq, n_embd), jnp.float32)
    w1, b1, w2, b2 = init_params(k_p, n_embd)

    # One-time persistent bf16 weight cast (NOT in the per-call path).
    w1b = w1.astype(jnp.bfloat16)
    w2b = w2.astype(jnp.bfloat16)

    out = feed_forward(x, w1b, b1, w2b, b2)
    out = jax.block_until_ready(out)

    # Reference in plain JAX with the same precision recipe
    # (bf16 matmul operands, f32 accumulation, f32 bias/GELU).
    x2d = x.reshape(-1, n_embd)
    h = jnp.dot(x2d.astype(jnp.bfloat16), w1b,
                preferred_element_type=jnp.float32) + b1
    h = _gelu_tanh(h)
    ref = jnp.dot(h.astype(jnp.bfloat16), w2b,
                  preferred_element_type=jnp.float32) + b2
    ref = ref.reshape(batch, seq, n_embd)

    assert out.shape == (batch, seq, n_embd)
    assert out.dtype == jnp.float32
    assert jnp.allclose(out, ref, atol=2e-3, rtol=2e-3), (
        f"max abs diff = {float(jnp.max(jnp.abs(out - ref)))}")

    print("KERNEL_OK")
</pallas_src>

<mosaic_0001>
module attributes {stable_mosaic.version = 11 : i64} {
  func.func @ffn_kernel(%arg0: i32, %arg1: i32, %arg2: memref<8x128xf32, #tpu.memory_space<vmem>>, %arg3: memref<128x512xbf16, #tpu.memory_space<vmem>>, %arg4: memref<1x512xf32, #tpu.memory_space<vmem>>, %arg5: memref<512x128xbf16, #tpu.memory_space<vmem>>, %arg6: memref<1x128xf32, #tpu.memory_space<vmem>>, %arg7: memref<8x128xf32, #tpu.memory_space<vmem>>) attributes {dimension_semantics = [#tpu.dimension_semantics<parallel>, #tpu.dimension_semantics<arbitrary>], iteration_bounds = array<i64: 2, 1>, scalar_prefetch = 0 : i64, scratch_operands = 0 : i64, tpu.core_type = #tpu.core_type<tc>, window_params = [{transform_indices = @transform_0, window_bounds = array<i64: 8, 128>}, {transform_indices = @transform_1, window_bounds = array<i64: 128, 512>}, {transform_indices = @transform_2, window_bounds = array<i64: 1, 512>}, {transform_indices = @transform_3, window_bounds = array<i64: 512, 128>}, {pipeline_mode = #tpu.pipeline_mode<synchronous>, transform_indices = @transform_4, window_bounds = array<i64: 1, 128>}, {transform_indices = @transform_5, window_bounds = array<i64: 8, 128>}]} {
    %c0_i32 = arith.constant 0 : i32
    %0 = arith.cmpi eq, %arg1, %c0_i32 : i32
    %1 = arith.extui %0 : i1 to i32
    %c0_i32_0 = arith.constant 0 : i32
    %2 = arith.cmpi ne, %1, %c0_i32_0 : i32
    scf.if %2 {
      %c0_17 = arith.constant 0 : index
      %c0_18 = arith.constant 0 : index
      %30 = vector.load %arg6[%c0_17, %c0_18] : memref<1x128xf32, #tpu.memory_space<vmem>>, vector<1x128xf32>
      %31 = vector.shape_cast %30 : vector<1x128xf32> to vector<1x128xf32>
      %32 = vector.broadcast %31 : vector<1x128xf32> to vector<8x128xf32>
      %c0_19 = arith.constant 0 : index
      %c0_20 = arith.constant 0 : index
      %33 = vector.load %arg7[%c0_19, %c0_20] : memref<8x128xf32, #tpu.memory_space<vmem>>, vector<8x128xf32>
      tpu.vector_store %arg7[%c0_19, %c0_20], %32 {strides = array<i32>} : memref<8x128xf32, #tpu.memory_space<vmem>>, vector<8x128xf32>,
    } else {
    }
    %c0 = arith.constant 0 : index
    %c0_1 = arith.constant 0 : index
    %3 = vector.load %arg2[%c0, %c0_1] : memref<8x128xf32, #tpu.memory_space<vmem>>, vector<8x128xf32>
    %4 = arith.truncf %3 : vector<8x128xf32> to vector<8x128xbf16>
    %c0_2 = arith.constant 0 : index
    %c0_3 = arith.constant 0 : index
    %5 = vector.load %arg3[%c0_2, %c0_3] : memref<128x512xbf16, #tpu.memory_space<vmem>>, vector<128x512xbf16>
    %cst = arith.constant dense<0.000000e+00> : vector<8x512xf32>
    %6 = tpu.matmul %4, %5, %cst {dimension_numbers = #tpu.dot_dimension_numbers<[1], [0], [0], [1], [0, 0, 1, 1], [], []>} : vector<8x128xbf16>, vector<128x512xbf16>, vector<8x512xf32> -> vector<8x512xf32>
    %c0_4 = arith.constant 0 : index
    %c0_5 = arith.constant 0 : index
    %7 = vector.load %arg4[%c0_4, %c0_5] : memref<1x512xf32, #tpu.memory_space<vmem>>, vector<1x512xf32>
    %8 = vector.broadcast %7 : vector<1x512xf32> to vector<8x512xf32>
    %9 = arith.addf %6, %8 : vector<8x512xf32>
    %cst_6 = arith.constant 0.636619746 : f32
    %10 = math.sqrt %cst_6 : f32
    %cst_7 = arith.constant 5.000000e-01 : f32
    %11 = vector.broadcast %cst_7 : f32 to vector<8x512xf32>
    %12 = arith.mulf %11, %9 : vector<8x512xf32>
    %cst_8 = arith.constant 4.471500e-02 : f32
    %13 = vector.broadcast %cst_8 : f32 to vector<8x512xf32>
    %14 = arith.mulf %13, %9 : vector<8x512xf32>
    %15 = arith.mulf %14, %9 : vector<8x512xf32>
    %16 = arith.mulf %15, %9 : vector<8x512xf32>
    %17 = arith.addf %9, %16 : vector<8x512xf32>
    %18 = vector.broadcast %10 : f32 to vector<8x512xf32>
    %19 = arith.mulf %18, %17 : vector<8x512xf32>
    %20 = math.tanh %19 : vector<8x512xf32>
    %cst_9 = arith.constant 1.000000e+00 : f32
    %21 = vector.broadcast %cst_9 : f32 to vector<8x512xf32>
    %22 = arith.addf %21, %20 : vector<8x512xf32>
    %23 = arith.mulf %12, %22 : vector<8x512xf32>
    %c0_10 = arith.constant 0 : index
    %c0_11 = arith.constant 0 : index
    %24 = vector.load %arg7[%c0_10, %c0_11] : memref<8x128xf32, #tpu.memory_space<vmem>>, vector<8x128xf32>
    %25 = arith.truncf %23 : vector<8x512xf32> to vector<8x512xbf16>
    %c0_12 = arith.constant 0 : index
    %c0_13 = arith.constant 0 : index
    %26 = vector.load %arg5[%c0_12, %c0_13] : memref<512x128xbf16, #tpu.memory_space<vmem>>, vector<512x128xbf16>
    %cst_14 = arith.constant dense<0.000000e+00> : vector<8x128xf32>
    %27 = tpu.matmul %25, %26, %cst_14 {dimension_numbers = #tpu.dot_dimension_numbers<[1], [0], [0], [1], [0, 0, 1, 1], [], []>} : vector<8x512xbf16>, vector<512x128xbf16>, vector<8x128xf32> -> vector<8x128xf32>
    %28 = arith.addf %24, %27 : vector<8x128xf32>
    %c0_15 = arith.constant 0 : index
    %c0_16 = arith.constant 0 : index
    %29 = vector.load %arg7[%c0_15, %c0_16] : memref<8x128xf32, #tpu.memory_space<vmem>>, vector<8x128xf32>
    tpu.vector_store %arg7[%c0_15, %c0_16], %28 {strides = array<i32>} : memref<8x128xf32, #tpu.memory_space<vmem>>, vector<8x128xf32>,
    return
  }
  func.func @transform_0(%arg0: i32, %arg1: i32) -> (i32, i32) {
    %c0_i32 = arith.constant 0 : i32
    %c0_i32_0 = arith.constant 0 : i32
    return %arg0, %c0_i32 : i32, i32
  }
  func.func @transform_1(%arg0: i32, %arg1: i32) -> (i32, i32) {
    %c0_i32 = arith.constant 0 : i32
    %c0_i32_0 = arith.constant 0 : i32
    return %c0_i32, %arg1 : i32, i32
  }
  func.func @transform_2(%arg0: i32, %arg1: i32) -> (i32, i32) {
    %c0_i32 = arith.constant 0 : i32
    %c0_i32_0 = arith.constant 0 : i32
    return %c0_i32, %arg1 : i32, i32
  }
  func.func @transform_3(%arg0: i32, %arg1: i32) -> (i32, i32) {
    %c0_i32 = arith.constant 0 : i32
    %c0_i32_0 = arith.constant 0 : i32
    return %arg1, %c0_i32 : i32, i32
  }
  func.func @transform_4(%arg0: i32, %arg1: i32) -> (i32, i32) {
    %c0_i32 = arith.constant 0 : i32
    %c0_i32_0 = arith.constant 0 : i32
    %c0_i32_1 = arith.constant 0 : i32
    return %c0_i32, %c0_i32_0 : i32, i32
  }
  func.func @transform_5(%arg0: i32, %arg1: i32) -> (i32, i32) {
    %c0_i32 = arith.constant 0 : i32
    %c0_i32_0 = arith.constant 0 : i32
    return %arg0, %c0_i32 : i32, i32
  }
}

</mosaic_0001>

<bundles_post_ra>
// kernel: _ffn_impl.1
= control target key start
LH: loop header
LB: loop body
LE: loop exit
PB: predicated region body
PF: predicated region fallthrough
CT: control target
= control target key end

     0   :  { %s1884_s0 = inlined_call_operand.hbm [shape: f32[16,128], index: 0, kind: input, shape index: {}]   ;;  %s1885_s1 = inlined_call_operand.hbm [shape: bf16[128,512], index: 1, kind: input, shape index: {}]   ;;  %s1886_s2 = inlined_call_operand.hbm [shape: f32[1,512], index: 2, kind: input, shape index: {}]   ;;  %s1887_s3 = inlined_call_operand.hbm [shape: bf16[512,128], index: 3, kind: input, shape index: {}]   ;;  %s1888_s4 = inlined_call_operand.vmem [shape: f32[1,128], index: 4, kind: input, shape index: {}]   ;;  %s1889_s5 = inlined_call_operand.hbm [shape: f32[16,128], index: 5, kind: output, shape index: {}]  }
   0x1   :  { %1894 = sst [smem:[#allocation15_spill]] %s1885_s1 }
   0x2   :  { %10 = vsyncpa [#allocation3], 0 }
   0x3   :  { %12 = vsyncpa [#allocation3 + $0x1], 0 }
   0x4   :  { %13 = vsyncpa [#allocation6], 0 }
   0x5   :  { %14 = vsyncpa [#allocation9], 0 }
   0x6   :  { %15 = vsyncpa [#allocation4], 0 }
   0x7   :  { %17 = vsyncpa [#allocation4 + $0x1], 0  ;;  %s1688_s18 = smov 0   ;;  %s1690_s19 = smov 0  }
   0x8   :  { %s1692_s20 = smov 0   ;;  %s1694_s21 = smov 0  }
   0x9   :  { %s1696_s22 = smov 0   ;;  %s1698_s23 = smov 0  }
   0xa LB: > { %s1138_s24 = sadd.s32 4294967295, %s1646_s23   ;;  %s1139_s25 = sadd.s32 4294967294, %s1646_s23   ;;  %s1646_s23 = sphi %s1698_s23, %s23_s23   ;;  %s1642_s22 = sphi %s1696_s22, %s1913_s22   ;;  %s1638_s21 = sphi %s1694_s21, %s1912_s21   ;;  %s1634_s20 = sphi %s1692_s20, %s1911_s20   ;;  %s1630_s19 = sphi %s1690_s19, %s1910_s19   ;;  %s1626_s18 = sphi %s1688_s18, %s1909_s18  }
   0xb   : > { %p55_p0 = scmp.ne.s32.totalorder %s1630_s19, %s1626_s18  ;;  %p1722_p1 = scmp.eq.s32.totalorder %s1138_s24, 0 }
   0xc   : > { %p1726_p2 = scmp.eq.s32.totalorder %s1138_s24, 1  ;;  %p184_p3 = scmp.eq.s32.totalorder %s1139_s25, 1 }
   0xd   : > { %s1895_s26 = scalar_select %p1722_p1, 1, 0 }
   0xe   : > { %p1732_p4 = por %p1722_p1, %p55_p0  ;;  %p1140_p5 = scmp.ge.s32.totalorder %s1646_s23, 1 }
   0xf   : > { %p1737_p6 = por %p184_p3, %p55_p0  ;;  %p191_p7 = scmp.lt.s32.totalorder %s1646_s23, 3 }
  0x10   : > { %s1897_s28 = scalar_select %p1732_p4, 1, 0 }
  0x11   : > { %s1898_s29 = scalar_select %p1737_p6, 1, 0 }
  0x12   : > { %p1742_p8 = pnand %p1140_p5, %p191_p7  ;;  %s1648_s6 = smov [#allocation5]  }
  0x13   : > { %s206_s7 = sshll.u32 %s1648_s6, 4  ;;  %s1649_s9 = smov [#allocation7]   ;;  %s207_s7 = int_to_ptr.vmem [resolvable:$true] %s206_s7 }
  0x14   : > { %s1899_s30 = scalar_select %p1742_p8, 1, 0 }
  0x15   : > { %p1282_p9 = pneg %p1742_p8  ;;  %s223_s10 = sshll.u32 %s1649_s9, 4  ;;  %s224_s10 = int_to_ptr.vmem [resolvable:$true] %s223_s10 }
  0x16   : > { %s1650_s11 = smov [#allocation8]   ;;  %s1463_s13 = scalar_lea.vmem %s207_s7, 4096 }
  0x17   : > { %p1751_p11 = pnand %p1282_p9, %p1722_p1  ;;  %s236_s12 = sshll.u32 %s1650_s11, 4  ;;  %s237_s12 = int_to_ptr.vmem [resolvable:$true] %s236_s12 }
  0x18   : > { %p1464_p13 = scmp.ne.s32.totalorder %s207_s7, %s1463_s13  ;;  %p1471_p5 = scmp.lt.s32.totalorder %s207_s7, %s207_s7 }
  0x19   : > { %p1454_p12 = pneg %p1751_p11  ;;  %p1472_p7 = scmp.lt.s32.totalorder %s1463_s13, %s1463_s13 }
  0x1b   : > { %p1466_p0 = pnand %p1464_p13, %p1454_p12  ;;  %p1473_p9 = por %p1472_p7, %p1471_p5 }
  0x1d   : > { %p1467_p3 = pneg %p1466_p0 }
  0x1f   : > { %p1474_p10 = pnand %p1473_p9, %p1467_p3 }
  0x21   : > { %1477 = shalt.err (!%p1474_p10)
}
  0x22   : > { %s1651_s14 = smov 256   ;;  %s1652_s15 = smov 16  }
  0x23   : > { %s1901_s1 = sld [smem:[#allocation15_spill]]  ;;  %s1489_s24 = scalar_lea.vmem %s224_s10, 64 }
  0x24   : > { %p1490_p6 = scmp.ne.s32.totalorder %s224_s10, %s1489_s24  ;;  %p1497_p1 = scmp.lt.s32.totalorder %s224_s10, %s224_s10 }
  0x25   : > { %p1498_p4 = scmp.lt.s32.totalorder %s1489_s24, %s1489_s24 }
  0x26   : > { %p1492_p13 = pnand %p1490_p6, %p1454_p12 }
  0x27   : > { %p1499_p5 = por %p1498_p4, %p1497_p1 }
  0x28   : > { %p1493_p0 = pneg %p1492_p13 }
  0x29   : > { %1285 = dma.hbm_to_vmem [thread:$0]  (!%p1751_p11), %s1901_s1, 4096, %s207_s7, [#allocation6], %s1651_s14, %s1651_s14, %s1652_s15  }
  0x2a   : > { %p1500_p3 = pnand %p1499_p5, %p1493_p0 }
  0x2c   : > { %1503 = shalt.err (!%p1500_p3)
}
  0x2d   : > { %1288 = dma.hbm_to_vmem [thread:$0]  (!%p1751_p11), %s1886_s2, 64, %s224_s10, [#allocation6]  }
  0x2e   : > { %s1515_s7 = scalar_lea.vmem %s237_s12, 4096  ;;  %p1523_p9 = scmp.lt.s32.totalorder %s237_s12, %s237_s12 }
  0x2f   : > { %p1516_p10 = scmp.ne.s32.totalorder %s237_s12, %s1515_s7  ;;  %p1524_p13 = scmp.lt.s32.totalorder %s1515_s7, %s1515_s7 }
  0x31   : > { %p1518_p7 = pnand %p1516_p10, %p1454_p12  ;;  %p1525_p8 = por %p1524_p13, %p1523_p9 }
  0x33   : > { %p1519_p6 = pneg %p1518_p7 }
  0x35   : > { %p1526_p1 = pnand %p1525_p8, %p1519_p6 }
  0x37   : > { %1529 = shalt.err (!%p1526_p1)
}
  0x38   : > { %s1653_s9 = smov 64   ;;  %s1654_s10 = smov 4  }
  0x39   : > { %1291 = dma.hbm_to_vmem [thread:$0]  (!%p1751_p11), %s1887_s3, 4096, %s237_s12, [#allocation9], %s1653_s9, %s1653_s9, %s1654_s10  }
  0x3a   : > { %s42_s14 = sadd.s32 1, %s1634_s20  ;;  %s35_s15 = sadd.s32 1, %s1642_s22 }
  0x3b   : > { %p49_p4 = scmp.ne.s32.totalorder %s1634_s20, %s1630_s19  ;;  %p37_p8 = scmp.ge.s32.totalorder %s35_s15, 2 }
  0x3c   : > { %p50_p12 = scmp.eq.s32.totalorder %s1646_s23, 0  ;;  %p1303_p5 = scmp.lt.s32.totalorder %s1646_s23, 2 }
  0x3d   : > { %p1788_p0 = por %p1726_p2, %p49_p4  ;;  %s1915_s15 = smov (%p37_p8, %s35_s15), 0 }
  0x3e   : > { %p51_p3 = por %p50_p12, %p49_p4  ;;  %s253_s8 = sand.u32 1, %s1634_s20  }
  0x3f   : > { %s39_s17 = ssub.s32 %s1642_s22, %s1915_s15  ;;  %s1145_s12 = sshll.u32 %s253_s8, 3 }
  0x40   : > { %p40_p10 = scmp.eq.s32.totalorder %s39_s17, 0  ;;  %s1146_s24 = sshll.u32 %s1642_s22, 7 }
  0x41   : > { %s262_s27 = scalar_lea.hbm %s1884_s0, %s1146_s24  ;;  %s257_s9 = scalar_lea.vmem [#allocation2], %s1145_s12 }
  0x42   : > { %s1800_s25 = scalar_select %p40_p10, %s1634_s20, %s42_s14  }
  0x43   : > { %s264_s10 = sshll.u32 %s257_s9, 4  ;;  %p1807_p2 = pnand %p1303_p5, %p51_p3  ;;  %s265_s10 = int_to_ptr.vmem [resolvable:$true] %s264_s10 }
  0x44   : > { %s254_s13 = scalar_lea.sflag [#allocation3], %s253_s8  ;;  %s1543_s17 = scalar_lea.vmem %s265_s10, 128 }
  0x45   : > { %p1532_p11 = pneg %p1807_p2  ;;  %p1544_p7 = scmp.ne.s32.totalorder %s265_s10, %s1543_s17 }
  0x46   : > { %s1655_s14 = smov [#allocation2]  }
  0x47   : > { %p1546_p6 = pnand %p1544_p7, %p1532_p11  ;;  %s1548_s1 = sshll.u32 %s1655_s14, 4  ;;  %s1549_s1 = int_to_ptr.vmem [resolvable:$false] %s1548_s1 }
  0x48   : > { %s1550_s24 = scalar_lea.vmem %s1549_s1, 256  ;;  %p1551_p13 = scmp.lt.s32.totalorder %s265_s10, %s1549_s1 }
  0x49   : > { %p1547_p9 = pneg %p1546_p6  ;;  %p1552_p1 = scmp.lt.s32.totalorder %s1550_s24, %s1543_s17 }
  0x4b   : > { %p1553_p4 = por %p1552_p1, %p1551_p13 }
  0x4d   : > { %p1554_p8 = pnand %p1553_p4, %p1547_p9 }
  0x4f   : > { %1557 = shalt.err (!%p1554_p8)
}
  0x50   : > { %1295 = dma.hbm_to_vmem [thread:$0]  (!%p1807_p2), %s262_s27, 128, %s265_s10, %s254_s13  }
  0x51   : > { %p1904_p12 = scmp.ne.s32.totalorder %s1899_s30, 0 }
  0x52   : > { %s1818_s8 = sand.u32 (!%p1904_p12), 1, %s1630_s19   ;;  %p1905_p5 = scmp.ne.s32.totalorder (!%p1904_p12), %s1897_s28, 0 }
  0x53   : > { %273 = sbr.rel (%p1904_p12) target bundleno = 571 (0x23b), region = 40  ;;  %s1148_s12 = sshll.u32 (!%p1904_p12), %s1818_s8, 3 }
  0x54   : > { %s276_s6 = scalar_lea.sflag (!%p1904_p12), [#allocation3], %s1818_s8  ;;  %s1824_s1 = scalar_lea.vmem (!%p1904_p12), [#allocation2], %s1148_s12 }
  0x58   : > { %1609 = dma.done.wait (%p1905_p5), %s276_s6, 128  }
  0x59   : > { %1611 = vsyncadd (%p1905_p5), %s276_s6, 4294967168  ;;  %p1906_p3 = scmp.ne.s32.totalorder %s1895_s26, 0 }
  0x5b   : > { %1613 = dma.done.wait (%p1906_p3), [#allocation6], 4160  }
  0x5c   : > { %1615 = vsyncadd (%p1906_p3), [#allocation6], 4294963136 }
  0x5d   : > { %1617 = dma.done.wait (%p1906_p3), [#allocation9], 4096  }
  0x5e   : > { %1619 = vsyncadd (%p1906_p3), [#allocation9], 4294963200  ;;  %v1656_v0 = vmov 0   ;;  %v1364_v1 = vld [vmem:[#allocation5 + $0xe4] ss:$16 sps:$4 sm:$0xff]   ;;  %v1412_v35 = vld [vmem:[#allocation8 + $0x78] sm:$0xff]  }
  0x5f   : > { %582 = vmatprep.mubr.bf16.mxu0 %v1656_v0  ;;  %623 = vmatprep.mubr.bf16.mxu1 %v1656_v0  ;;  %v1366_v2 = vld [vmem:[#allocation5 + $0xec] ss:$16 sps:$4 sm:$0xff]   ;;  %v1368_v3 = vld [vmem:[#allocation5 + $0xe0] ss:$16 sps:$4 sm:$0xff]   ;;  %v1369_v4 = vld [vmem:[#allocation5 + $0xe8] ss:$16 sps:$4 sm:$0xff]  }
  0x60   : > { %550 = vmatprep.subr.bf16.mxu0 %v1364_v1  ;;  %591 = vmatprep.subr.bf16.mxu1 %v1366_v2  ;;  %v1370_v5 = vld [vmem:[#allocation5 + $0xc4] ss:$16 sps:$4 sm:$0xff]   ;;  %v1372_v6 = vld [vmem:[#allocation5 + $0xcc] ss:$16 sps:$4 sm:$0xff]   ;;  %v1374_v7 = vld [vmem:[#allocation5 + $0xc0] ss:$16 sps:$4 sm:$0xff]  }
  0x61   : > { %551 = vmatpush1.bf16.msra.mxu0 %v1368_v3  ;;  %592 = vmatpush1.bf16.msra.mxu1 %v1369_v4  ;;  %v1375_v8 = vld [vmem:[#allocation5 + $0xc8] ss:$16 sps:$4 sm:$0xff]   ;;  %v1376_v9 = vld [vmem:[#allocation5 + $0xa4] ss:$16 sps:$4 sm:$0xff]   ;;  %v1378_v10 = vld [vmem:[#allocation5 + $0xac] ss:$16 sps:$4 sm:$0xff]   ;;  %v370_v3 = vlaneseq }
  0x62   : > { %552 = vmatprep.subr.bf16.mxu0 %v1370_v5  ;;  %593 = vmatprep.subr.bf16.mxu1 %v1372_v6  ;;  %v1380_v11 = vld [vmem:[#allocation5 + $0xa0] ss:$16 sps:$4 sm:$0xff]   ;;  %v1381_v12 = vld [vmem:[#allocation5 + $0xa8] ss:$16 sps:$4 sm:$0xff]   ;;  %v1382_v13 = vld [vmem:[#allocation5 + $0x84] ss:$16 sps:$4 sm:$0xff]  }
  0x63   : > { %v1384_v14 = vld [vmem:[#allocation5 + $0x8c] ss:$16 sps:$4 sm:$0xff]   ;;  %v1386_v15 = vld [vmem:[#allocation5 + $0x80] ss:$16 sps:$4 sm:$0xff]   ;;  %v1387_v16 = vld [vmem:[#allocation5 + $0x88] ss:$16 sps:$4 sm:$0xff]  }
  0x64   : > { %v1388_v17 = vld [vmem:[#allocation5 + $0x64] ss:$16 sps:$4 sm:$0xff]   ;;  %v1390_v18 = vld [vmem:[#allocation5 + $0x6c] ss:$16 sps:$4 sm:$0xff]   ;;  %v1392_v19 = vld [vmem:[#allocation5 + $0x60] ss:$16 sps:$4 sm:$0xff]  }
  0x65   : > { %553 = vmatpush1.bf16.msra.mxu0 %v1374_v7  ;;  %594 = vmatpush1.bf16.msra.mxu1 %v1375_v8  ;;  %v1393_v20 = vld [vmem:[#allocation5 + $0x68] ss:$16 sps:$4 sm:$0xff]   ;;  %v1394_v21 = vld [vmem:[#allocation5 + $0x44] ss:$16 sps:$4 sm:$0xff]   ;;  %v1396_v22 = vld [vmem:[#allocation5 + $0x4c] ss:$16 sps:$4 sm:$0xff]  }
  0x66   : > { %554 = vmatprep.subr.bf16.mxu0 %v1376_v9  ;;  %595 = vmatprep.subr.bf16.mxu1 %v1378_v10  ;;  %v1398_v23 = vld [vmem:[#allocation5 + $0x40] ss:$16 sps:$4 sm:$0xff]   ;;  %v1399_v24 = vld [vmem:[#allocation5 + $0x48] ss:$16 sps:$4 sm:$0xff]   ;;  %v1400_v25 = vld [vmem:[#allocation5 + $0x24] ss:$16 sps:$4 sm:$0xff]  }
  0x67   : > { %v1402_v26 = vld [vmem:[#allocation5 + $0x2c] ss:$16 sps:$4 sm:$0xff]   ;;  %v1404_v27 = vld [vmem:[#allocation5 + $0x20] ss:$16 sps:$4 sm:$0xff]   ;;  %v1405_v28 = vld [vmem:[#allocation5 + $0x28] ss:$16 sps:$4 sm:$0xff]  }
  0x68   : > { %v1406_v29 = vld [vmem:[#allocation5 + $0x4] ss:$16 sps:$4 sm:$0xff]   ;;  %v1408_v30 = vld [vmem:[#allocation5 + $0xc] ss:$16 sps:$4 sm:$0xff]   ;;  %v1410_v31 = vld [vmem:[#allocation5] ss:$16 sps:$4 sm:$0xff]  }
  0x69   : > { %555 = vmatpush1.bf16.msra.mxu0 %v1380_v11  ;;  %596 = vmatpush1.bf16.msra.mxu1 %v1381_v12  ;;  %v1411_v32 = vld [vmem:[#allocation5 + $0x8] ss:$16 sps:$4 sm:$0xff]   ;;  %v1413_v36 = vld [vmem:[#allocation8 + $0xf8] sm:$0xff]   ;;  %v1420_v43 = vld [vmem:[#allocation8 + $0x68] sm:$0xff]   ;;  %v371_v4 = vshrl.u32 %v370_v3, 7  ;;  %s1219_s30 = sshll.u32 %s1638_s21, 7 }
  0x6a   : > { %556 = vmatprep.subr.bf16.mxu0 %v1382_v13  ;;  %597 = vmatprep.subr.bf16.mxu1 %v1384_v14  ;;  %v334_v33 = vld [vmem:[%s1824_s1] sm:$0xff]  ;;  %v1424_v47 = vld [vmem:[#allocation8 + $0x60] sm:$0xff]   ;;  %v368_v7 = vld [vmem:[#allocation7] sm:$0xf]  ;;  %s317_s7 = scalar_lea.vmem [#allocation10], %s1148_s12  ;;  %s1023_s11 = scalar_lea.hbm %s1889_s5, %s1219_s30 }
  0x6b   : > { %v335_v34 = vpack.c.bf16 %v334_v33, %v334_v33  ;;  %v1414_v37 = vld [vmem:[#allocation8 + $0x38] sm:$0xff]   ;;  %v1416_v39 = vld [vmem:[#allocation8 + $0x70] sm:$0xff]   ;;  %v1421_v44 = vld [vmem:[#allocation8 + $0xe8] sm:$0xff]   ;;  %v372_v5 = vsub.s32 0, %v371_v4  ;;  %v380_v6 = vsub.s32 2, %v371_v4  ;;  %v376_v8 = vsub.s32 1, %v371_v4 }
  0x6c   : > { %v1415_v38 = vld [vmem:[#allocation8 + $0xb8] sm:$0xff]   ;;  %v1417_v40 = vld [vmem:[#allocation8 + $0xf0] sm:$0xff]   ;;  %v1422_v45 = vld [vmem:[#allocation8 + $0x28] sm:$0xff]   ;;  %v384_v9 = vsub.s32 3, %v371_v4  ;;  %s1025_s27 = sshll.u32 %s317_s7, 4  ;;  %s1012_s13 = scalar_lea.sflag [#allocation4], %s1818_s8  ;;  %s1026_s27 = int_to_ptr.vmem [resolvable:$true] %s1025_s27 }
  0x6d   : > { %557 = vmatpush1.bf16.msra.mxu0 %v1386_v15  ;;  %598 = vmatpush1.bf16.msra.mxu1 %v1387_v16  ;;  %v1418_v41 = vld [vmem:[#allocation8 + $0x30] sm:$0xff]   ;;  %v1423_v46 = vld [vmem:[#allocation8 + $0xa8] sm:$0xff]   ;;  %v1425_v48 = vld [vmem:[#allocation8 + $0xe0] sm:$0xff]   ;;  %v373_v10 = vrot.slane %v368_v7, %v372_v5  ;;  %v381_v11 = vrot.slane %v368_v7, %v380_v6  ;;  %v377_v12 = vrot.slane %v368_v7, %v376_v8  ;;  %s1558_s17 = scalar_lea.vmem %s1026_s27, 128  ;;  %s1657_s21 = smov [#allocation10]  }
  0x6e   : > { %558 = vmatprep.subr.bf16.mxu0 %v1388_v17  ;;  %599 = vmatprep.subr.bf16.mxu1 %v1390_v18  ;;  %v1419_v42 = vld [vmem:[#allocation8 + $0xb0] sm:$0xff]   ;;  %v1426_v49 = vld [vmem:[#allocation8 + $0x20] sm:$0xff]   ;;  %v1428_v51 = vld [vmem:[#allocation8 + $0x58] sm:$0xff]   ;;  %v385_v13 = vrot.slane %v368_v7, %v384_v9  ;;  %p1559_p10 = scmp.ne.s32.totalorder %s1026_s27, %s1558_s17  ;;  %s1562_s14 = sshll.u32 %s1657_s21, 4  ;;  %s1563_s14 = int_to_ptr.vmem [resolvable:$false] %s1562_s14 }
  0x6f   : > { %v1427_v50 = vld [vmem:[#allocation8 + $0xa0] sm:$0xff]   ;;  %v1429_v52 = vld [vmem:[#allocation8 + $0xd8] sm:$0xff]   ;;  %v1432_v55 = vld [vmem:[#allocation8 + $0x50] sm:$0xff]   ;;  %s1564_s24 = scalar_lea.vmem %s1563_s14, 256  ;;  %p1565_p7 = scmp.lt.s32.totalorder %s1026_s27, %s1563_s14 }
  0x70   : > { %v1430_v53 = vld [vmem:[#allocation8 + $0x18] sm:$0xff]   ;;  %v1433_v56 = vld [vmem:[#allocation8 + $0xd0] sm:$0xff]   ;;  %v1436_v59 = vld [vmem:[#allocation8 + $0x48] sm:$0xff]   ;;  %p1560_p2 = pnand %p1559_p10, %p1788_p0  ;;  %p1566_p6 = scmp.lt.s32.totalorder %s1564_s24, %s1558_s17 }
  0x71   : > { %559 = vmatpush1.bf16.msra.mxu0 %v1392_v19  ;;  %600 = vmatpush1.bf16.msra.mxu1 %v1393_v20  ;;  %v1431_v54 = vld [vmem:[#allocation8 + $0x98] sm:$0xff]   ;;  %v1434_v57 = vld [vmem:[#allocation8 + $0x10] sm:$0xff]   ;;  %v1437_v60 = vld [vmem:[#allocation8 + $0xc8] sm:$0xff]  }
  0x72   : > { %560 = vmatprep.subr.bf16.mxu0 %v1394_v21  ;;  %601 = vmatprep.subr.bf16.mxu1 %v1396_v22  ;;  %v1435_v58 = vld [vmem:[#allocation8 + $0x90] sm:$0xff]   ;;  %v1438_v61 = vld [vmem:[#allocation8 + $0x8] sm:$0xff]   ;;  %v1440_v63 = vld [vmem:[#allocation8 + $0x40] sm:$0xff]   ;;  %p1561_p11 = pneg %p1560_p2  ;;  %p1567_p9 = por %p1566_p6, %p1565_p7 }
  0x73   : > { %v1439_v62 = vld [vmem:[#allocation8 + $0x88] sm:$0xff]   ;;  %v1441_v0 = vld [vmem:[#allocation8 + $0xc0] sm:$0xff]  }
  0x74   : > { %v1442_v1 = vld [vmem:[#allocation8] sm:$0xff]   ;;  %v1153_v9 = vld [vmem:[%s1888_s4] ss:$0 sm:$0xff]  ;;  %p1568_p13 = pnand %p1567_p9, %p1561_p11 }
  0x75   : > { %561 = vmatpush1.bf16.msra.mxu0 %v1398_v23  ;;  %602 = vmatpush1.bf16.msra.mxu1 %v1399_v24  ;;  %v1443_v2 = vld [vmem:[#allocation8 + $0x80] sm:$0xff]  }
  0x76   : > { %562 = vmatprep.subr.bf16.mxu0 %v1400_v25  ;;  %603 = vmatprep.subr.bf16.mxu1 %v1402_v26 }
  0x79   : > { %563 = vmatpush1.bf16.msra.mxu0 %v1404_v27  ;;  %604 = vmatpush1.bf16.msra.mxu1 %v1405_v28 }
  0x7a   : > { %564 = vmatprep.subr.bf16.mxu0 %v1406_v29  ;;  %605 = vmatprep.subr.bf16.mxu1 %v1408_v30 }
  0x7d   : > { %565 = vmatpush1.bf16.msra.mxu0 %v1410_v31  ;;  %606 = vmatpush1.bf16.msra.mxu1 %v1411_v32 }
  0x7e   : > { %1222 = vmatprep.subr.bf16.mxu0 %v1412_v35  ;;  %1244 = vmatprep.subr.bf16.mxu1 %v1413_v36 }
  0x80   : > { %583 = vmatmul.mubr.bf16.vlgmr.msra.gmra.mxu0 %v335_v34  ;;  %624 = vmatmul.mubr.bf16.vlgmr.msra.gmra.mxu1 %v335_v34 }
  0x81   : > { %1223 = vmatpush3.bf16.msra.mxu0 %v1414_v37  ;;  %1245 = vmatpush3.bf16.msra.mxu1 %v1415_v38 }
  0x82   : > { %1224 = vmatprep.subr.bf16.mxu0 %v1416_v39  ;;  %1246 = vmatprep.subr.bf16.mxu1 %v1417_v40 }
  0x85   : > { %1225 = vmatpush3.bf16.msra.mxu0 %v1418_v41  ;;  %1247 = vmatpush3.bf16.msra.mxu1 %v1419_v42 }
  0x86   : > { %1226 = vmatprep.subr.bf16.mxu0 %v1420_v43  ;;  %1248 = vmatprep.subr.bf16.mxu1 %v1421_v44 }
  0x89   : > { %1227 = vmatpush3.bf16.msra.mxu0 %v1422_v45  ;;  %1249 = vmatpush3.bf16.msra.mxu1 %v1423_v46 }
  0x8a   : > { %1228 = vmatprep.subr.bf16.mxu0 %v1424_v47  ;;  %1250 = vmatprep.subr.bf16.mxu1 %v1425_v48 }
  0x8d   : > { %1229 = vmatpush3.bf16.msra.mxu0 %v1426_v49  ;;  %1251 = vmatpush3.bf16.msra.mxu1 %v1427_v50 }
  0x8e   : > { %1230 = vmatprep.subr.bf16.mxu0 %v1428_v51  ;;  %1252 = vmatprep.subr.bf16.mxu1 %v1429_v52 }
  0x91   : > { %1231 = vmatpush3.bf16.msra.mxu0 %v1430_v53  ;;  %1253 = vmatpush3.bf16.msra.mxu1 %v1431_v54 }
  0x92   : > { %1232 = vmatprep.subr.bf16.mxu0 %v1432_v55  ;;  %1254 = vmatprep.subr.bf16.mxu1 %v1433_v56 }
  0x95   : > { %1233 = vmatpush3.bf16.msra.mxu0 %v1434_v57  ;;  %1255 = vmatpush3.bf16.msra.mxu1 %v1435_v58 }
  0x96   : > { %1234 = vmatprep.subr.bf16.mxu0 %v1436_v59  ;;  %1256 = vmatprep.subr.bf16.mxu1 %v1437_v60 }
  0x99   : > { %1235 = vmatpush3.bf16.msra.mxu0 %v1438_v61  ;;  %1257 = vmatpush3.bf16.msra.mxu1 %v1439_v62 }
  0x9a   : > { %1236 = vmatprep.subr.bf16.mxu0 %v1440_v63  ;;  %1258 = vmatprep.subr.bf16.mxu1 %v1441_v0 }
  0x9d   : > { %1237 = vmatpush3.bf16.msra.mxu0 %v1442_v1  ;;  %1259 = vmatpush3.bf16.msra.mxu1 %v1443_v2 }
 0x140   : > { %v584_v14 = vpop.f32.mrf.mxu0  ;;  %v625_v15 = vpop.f32.mrf.mxu1 }
 0x141   : > { %v585_v16 = vadd.f32 %v584_v14, %v373_v10  ;;  %v626_v17 = vadd.f32 %v625_v15, %v381_v11 }
 0x142   : > { %v586_v18 = vpop.f32.mrf.mxu0  ;;  %v627_v19 = vpop.f32.mrf.mxu1 }
 0x143   : > { %v636_v20 = vmul.f32 0.044715, %v585_v16  ;;  %v638_v21 = vmul.f32 0.044715, %v626_v17  ;;  %v587_v22 = vadd.f32 %v586_v18, %v377_v12  ;;  %v628_v23 = vadd.f32 %v627_v19, %v385_v13 }
 0x144   : > { %v588_v24 = vpop.f32.mrf.mxu0  ;;  %v629_v25 = vpop.f32.mrf.mxu1  ;;  %v632_v50 = vmul.f32 0.5, %v585_v16  ;;  %v634_v55 = vmul.f32 0.5, %v626_v17 }
 0x145   : > { %v640_v26 = vmul.f32 %v636_v20, %v585_v16  ;;  %v642_v27 = vmul.f32 %v638_v21, %v626_v17  ;;  %v637_v28 = vmul.f32 0.044715, %v587_v22  ;;  %v639_v29 = vmul.f32 0.044715, %v628_v23 }
 0x146   : > { %v589_v30 = vpop.f32.mrf.mxu0  ;;  %v630_v31 = vpop.f32.mrf.mxu1  ;;  %v633_v53 = vmul.f32 0.5, %v587_v22  ;;  %v635_v56 = vmul.f32 0.5, %v628_v23 }
 0x147   : > { %v644_v32 = vmul.f32 %v640_v26, %v585_v16  ;;  %v646_v33 = vmul.f32 %v642_v27, %v626_v17  ;;  %v641_v34 = vmul.f32 %v637_v28, %v587_v22  ;;  %v643_v35 = vmul.f32 %v639_v29, %v628_v23 }
 0x149   : > { %v648_v36 = vadd.f32 %v644_v32, %v585_v16  ;;  %v650_v37 = vadd.f32 %v646_v33, %v626_v17  ;;  %v645_v38 = vmul.f32 %v641_v34, %v587_v22  ;;  %v647_v39 = vmul.f32 %v643_v35, %v628_v23 }
 0x14b   : > { %v652_v40 = vmul.f32 0.7978845, %v648_v36  ;;  %v654_v41 = vmul.f32 0.7978845, %v650_v37  ;;  %v649_v42 = vadd.f32 %v645_v38, %v587_v22  ;;  %v651_v43 = vadd.f32 %v647_v39, %v628_v23 }
 0x14d   : > { %v653_v44 = vmul.f32 0.7978845, %v649_v42  ;;  %v655_v45 = vmul.f32 0.7978845, %v651_v43  ;;  %1444 = vtanh.f32 %v652_v40 }
 0x14e   : > { %1446 = vtanh.f32 %v654_v41 }
 0x14f   : > { %1448 = vtanh.f32 %v653_v44 }
 0x150   : > { %1450 = vtanh.f32 %v655_v45 }
 0x15a   : > { %v1445_v46 = vpop.eup %1444 }
 0x15b   : > { %v1447_v47 = vpop.eup %1446  ;;  %v660_v48 = vadd.f32 1.0, %v1445_v46 }
 0x15c   : > { %v1449_v49 = vpop.eup %1448  ;;  %v662_v51 = vadd.f32 1.0, %v1447_v47 }
 0x15d   : > { %v1451_v52 = vpop.eup %1450  ;;  %v661_v54 = vadd.f32 1.0, %v1449_v49  ;;  %v664_v58 = vmul.f32 %v660_v48, %v632_v50 }
 0x15e   : > { %v663_v57 = vadd.f32 1.0, %v1451_v52  ;;  %v666_v60 = vmul.f32 %v662_v51, %v634_v55 }
 0x15f   : > { %v665_v59 = vmul.f32 %v661_v54, %v633_v53  ;;  %v669_v0 = vpack.c.bf16 %v664_v58, %v664_v58 }
 0x160   : > { %v667_v61 = vmul.f32 %v663_v57, %v635_v56  ;;  %v671_v1 = vpack.c.bf16 %v666_v60, %v666_v60 }
 0x161   : > { %v670_v62 = vpack.c.bf16 %v665_v59, %v665_v59 }
 0x162   : > { %v672_v63 = vpack.c.bf16 %v667_v61, %v667_v61 }
 0x163   : > { %961 = vmatprep.mubr.bf16.mxu0 %v670_v62 }
 0x164   : > { %1001 = vmatprep.mubr.bf16.mxu1 %v672_v63  ;;  %962 = vmatmul.mubr.bf16.vlgmr.msra.gmra.mxu0 %v669_v0 }
 0x165   : > { %1002 = vmatmul.mubr.bf16.vlgmr.msra.gmra.mxu1 %v671_v1 }
 0x224   : > { %v1238_v2 = vpop.f32.mrf.mxu0 }
 0x225   : > { %v1260_v3 = vpop.f32.mrf.mxu1 }
 0x226   : > { %v1239_v4 = vpop.f32.mrf.mxu0 }
 0x227   : > { %v1240_v5 = vadd.f32 %v1239_v4, %v1238_v2  ;;  %v1261_v6 = vpop.f32.mrf.mxu1 }
 0x228   : > { %v1262_v7 = vadd.f32 %v1261_v6, %v1260_v3  ;;  %v1241_v8 = vpop.f32.mrf.mxu0 }
 0x229   : > { %v1263_v10 = vpop.f32.mrf.mxu1 }
 0x22a   : > { %v1004_v11 = vadd.f32 %v1262_v7, %v1240_v5  ;;  %v1242_v12 = vpop.f32.mrf.mxu0 }
 0x22b   : > { %v1264_v13 = vpop.f32.mrf.mxu1 }
 0x22c   : > { %v1009_v14 = vadd.f32 %v1153_v9, %v1004_v11 }
 0x22e   : > { %1010 = vst [vmem:[%s317_s7] sm:$0xff] %v1009_v14 }
 0x22f   : > { %1571 = shalt.err (!%p1568_p13)
}
 0x230   : > { %s1572_s12 = scalar_lea.hbm %s1023_s11, 128  ;;  %s1576_s1 = scalar_lea.hbm %s1889_s5, 256 }
 0x231   : > { %p1573_p1 = scmp.ne.s32.totalorder %s1023_s11, %s1572_s12  ;;  %p1577_p12 = scmp.lt.s32.totalorder %s1023_s11, %s1889_s5 }
 0x232   : > { %p1578_p5 = scmp.lt.s32.totalorder %s1576_s1, %s1572_s12 }
 0x233   : > { %p1574_p4 = pnand %p1573_p1, %p1788_p0 }
 0x234   : > { %p1579_p3 = por %p1578_p5, %p1577_p12 }
 0x235   : > { %p1575_p8 = pneg %p1574_p4 }
 0x237   : > { %p1580_p10 = pnand %p1579_p3, %p1575_p8 }
 0x239   : > { %1583 = shalt.err (!%p1580_p10)
}
 0x23a   : > { %1280 = dma.vmem_to_hbm [thread:$0]  (%p1788_p0), %s1026_s27, 128, %s1023_s11, %s1012_s13  }
 0x23b PF: > { %s1037_s30 = sand.u32 1, %s1626_s18   ;;  %p1907_p2 = scmp.ne.s32.totalorder %s1898_s29, 0 }
 0x23c   : > { %p1908_p11 = scmp.ge.s32.totalorder %s1646_s23, 2  ;;  %s1038_s7 = scalar_lea.sflag [#allocation4], %s1037_s30 }
 0x23e   : > { %p1297_p7 = pnand %p1908_p11, %p1907_p2 }
 0x240   : > { %p1298_p6 = pneg %p1297_p7 }
 0x242   : > { %1621 = dma.done.wait (%p1298_p6), %s1038_s7, 128  }
 0x243   : > { %1623 = vsyncadd (%p1298_p6), %s1038_s7, 4294967168  ;;  %s23_s23 = sadd.s32 1, %s1646_s23   ;;  %s1909_s18 = smov %s1630_s19 }
 0x244   : > { %p20_p9 = scmp.ge.s32.totalorder %s23_s23, 4   ;;  %s1910_s19 = smov %s1634_s20 }
 0x245   : > { %s1911_s20 = smov %s1800_s25  ;;  %s1912_s21 = smov %s1642_s22 }
 0x246   : > { %s1913_s22 = smov %s1915_s15  ;;  %22 = sbr.rel (!%p20_p9) target bundleno = 10 (0xa), region = 104 }
 0x24b   :  { %1043 = vsyncpa [#allocation3], 1 }
 0x24c   :  { %1045 = vsyncpa [#allocation3 + $0x1], 1 }
 0x24d   :  { %1046 = vsyncpa [#allocation6], 1 }
 0x24e   :  { %1047 = vsyncpa [#allocation9], 1 }
 0x24f   :  { %1048 = vsyncpa [#allocation4], 1 }
 0x250   :  { %1050 = vsyncpa [#allocation4 + $0x1], 1 }

</bundles_post_ra>
